<compile_context>
chip_gen: v5e
topology: v5e:2x2
jax: 0.10.0
libtpu: 0.0.40
codegen_flags: <defaults>
</compile_context>

<pallas_src>
import functools

import jax
import jax.numpy as jnp
from jax.experimental import pallas as pl
from jax.experimental.pallas import tpu as pltpu

BN_EPS = 1e-5


def _round_up(v, m):
    return (v + m - 1) // m * m


def _vmem_limit_bytes():
    """Generation-aware scoped-VMEM limit (v7x has 64 MiB physical; v5e/v6e 128 MiB)."""
    cap = 64 * 1024 * 1024  # conservative fallback = v7x per-TC VMEM
    try:
        cap = int(pltpu.get_tpu_info().vmem_capacity_bytes)
    except Exception:
        pass
    return max(32 * 1024 * 1024, min(int(cap * 0.6), 64 * 1024 * 1024))


def _pick_tile_c(bp_est, dp, c_rounded, budget_bytes):
    """Largest lane-dense C tile whose double-buffered working set fits the budget."""
    per_lane = 2 * (dp * 2) + 2 * (bp_est * 4)   # dbl-buffered W (bf16) + logits (f32)
    fixed = 2 * bp_est * dp * 2                  # resident f (bf16), double-buffered
    avail = max(budget_bytes - fixed, per_lane * 128)
    tc = (avail // per_lane // 128) * 128
    tc = max(128, min(tc, 2048, c_rounded))
    return int(tc)


# ---------------------------------------------------------------------------
# Kernels
# ---------------------------------------------------------------------------
def _bn_kernel(x_ref, gamma_ref, beta_ref, feat_ref, fbf_ref, *, true_b):
    """BatchNorm1d (training mode, biased variance). Padded batch rows are zero, so
    sum(x) and sum(x*x) already exclude them; divide by the true batch size."""
    x = x_ref[...]                                              # [Bp, Dp] f32
    inv_b = jnp.float32(1.0 / true_b)
    mean = jnp.sum(x, axis=0, keepdims=True) * inv_b            # [1, Dp]
    var = jnp.maximum(
        jnp.sum(x * x, axis=0, keepdims=True) * inv_b - mean * mean, 0.0)
    scale = jax.lax.rsqrt(var + BN_EPS) * gamma_ref[...]        # fold gamma into 1/std
    f = (x - mean) * scale + beta_ref[...]                      # [Bp, Dp] f32
    feat_ref[...] = f                                           # f32 features out
    fbf_ref[...] = f.astype(fbf_ref.dtype)                      # bf16 copy for the MXU


def _classifier_kernel(f_ref, w_ref, logits_ref):
    """Linear(D, C, bias=False): one bf16 MXU matmul per C tile, f32 accumulation."""
    logits_ref[...] = jnp.dot(f_ref[...], w_ref[...],
                              preferred_element_type=jnp.float32)


# ---------------------------------------------------------------------------
# One-time parameter preparation (hoisted out of the per-call path)
# ---------------------------------------------------------------------------
def prepare_classification_params(gamma, beta, w_cls, *, tile_c=None, max_batch=64):
    """gamma/beta: [D] BN affine params; w_cls: [C, D] classifier weight (PyTorch layout).
    Pads / casts everything once so the forward pass never re-touches W."""
    D = int(gamma.shape[0])
    C = int(w_cls.shape[0])

    Dp = max(_round_up(D, 128), 128)
    Cr = max(_round_up(C, 128), 128)
    bp_est = max(_round_up(max_batch, 8), 8)

    vmem_limit = _vmem_limit_bytes()
    budget = max(vmem_limit - 8 * 1024 * 1024, 16 * 1024 * 1024)
    if tile_c is None:
        tc = _pick_tile_c(bp_est, Dp, Cr, budget)
    else:
        tc = max(128, min(_round_up(int(tile_c), 128), Cr))
    Cp = _round_up(Cr, tc)
    n_ct = Cp // tc

    # Padded D columns: gamma=1, beta=0 (keeps f=0 there); padded W rows/cols are zero,
    # so they cannot leak into real logits.
    gamma_p = jnp.ones((1, Dp), jnp.float32).at[0, :D].set(gamma.astype(jnp.float32))
    beta_p = jnp.zeros((1, Dp), jnp.float32).at[0, :D].set(beta.astype(jnp.float32))
    w_p = jnp.zeros((Dp, Cp), jnp.bfloat16).at[:D, :C].set(
        jnp.transpose(w_cls).astype(jnp.bfloat16))

    return {
        "D": D, "C": C, "Dp": Dp, "Cp": Cp, "tc": tc, "n_ct": n_ct,
        "gamma_p": gamma_p, "beta_p": beta_p, "w_p": w_p,
        "vmem_limit": vmem_limit,
    }


# ---------------------------------------------------------------------------
# Forward
# ---------------------------------------------------------------------------
def classification_block(x, params):
    """x: [B, D, 1, 1], [B, D] or [D]. Returns (logits [B, C] f32, feats [B, D] f32)."""
    # glue: mirrors x.squeeze().squeeze() / unsqueeze(0)
    if x.ndim == 4:
        x = x.reshape(x.shape[0], x.shape[1])
    if x.ndim == 1:
        x = x[None, :]
    B, D = x.shape
    assert D == params["D"], "input feature dim does not match prepared params"
    Dp, Cp, tc, n_ct = params["Dp"], params["Cp"], params["tc"], params["n_ct"]
    C = params["C"]
    Bp = max(_round_up(B, 8), 8)

    # Only the (small) activation is padded per call; padded rows/columns are zero.
    x_p = jnp.zeros((Bp, Dp), jnp.float32).at[:B, :D].set(x.astype(jnp.float32))

    # ---- pass 1: BatchNorm1d -> feats (f32) + f (bf16) ----------------------
    feats_p, f_bf16 = pl.pallas_call(
        functools.partial(_bn_kernel, true_b=B),
        out_shape=(
            jax.ShapeDtypeStruct((Bp, Dp), jnp.float32),
            jax.ShapeDtypeStruct((Bp, Dp), jnp.bfloat16),
        ),
        grid_spec=pltpu.PrefetchScalarGridSpec(
            num_scalar_prefetch=0,
            grid=(1,),
            in_specs=[
                pl.BlockSpec((Bp, Dp), lambda i: (0, 0)),   # x
                pl.BlockSpec((1, Dp), lambda i: (0, 0)),    # gamma
                pl.BlockSpec((1, Dp), lambda i: (0, 0)),    # beta
            ],
            out_specs=(
                pl.BlockSpec((Bp, Dp), lambda i: (0, 0)),   # feats (f32)
                pl.BlockSpec((Bp, Dp), lambda i: (0, 0)),   # f (bf16) for the matmul
            ),
        ),
        compiler_params=pltpu.CompilerParams(dimension_semantics=("arbitrary",)),
    )(x_p, params["gamma_p"], params["beta_p"])

    # ---- pass 2: classifier matmul, streaming W over lane-dense C tiles -----
    cost = pl.CostEstimate(
        flops=2 * Bp * Dp * Cp,
        transcendentals=0,
        bytes_accessed=(Bp * Dp * 2          # f (bf16)
                        + Dp * Cp * 2        # W (bf16)
                        + Bp * Cp * 4),      # logits out (f32)
    )

    logits_p = pl.pallas_call(
        _classifier_kernel,
        out_shape=jax.ShapeDtypeStruct((Bp, Cp), jnp.float32),
        grid_spec=pltpu.PrefetchScalarGridSpec(
            num_scalar_prefetch=0,
            grid=(n_ct,),
            in_specs=[
                pl.BlockSpec((Bp, Dp), lambda j: (0, 0)),   # f (resident, read-only)
                pl.BlockSpec((Dp, tc), lambda j: (0, j)),   # W tile (pipelined over C)
            ],
            out_specs=pl.BlockSpec((Bp, tc), lambda j: (0, j)),   # logits tile
        ),
        compiler_params=pltpu.CompilerParams(
            # No state is carried across the C axis -> "parallel" lets v7x split the
            # W stream across both TensorCores; harmless on v5e/v6e (1 TC).
            dimension_semantics=("parallel",),
            vmem_limit_bytes=params["vmem_limit"],
        ),
        cost_estimate=cost,
    )(f_bf16, params["w_p"])

    return logits_p[:B, :C], feats_p[:B, :D]


# ---------------------------------------------------------------------------
# Reference + self-test
# ---------------------------------------------------------------------------
def _reference(x, gamma, beta, w_cls):
    x2 = x.reshape(x.shape[0], x.shape[1]).astype(jnp.float32)
    mean = jnp.mean(x2, axis=0, keepdims=True)
    var = jnp.mean((x2 - mean) ** 2, axis=0, keepdims=True)
    f = (x2 - mean) * jax.lax.rsqrt(var + BN_EPS) * gamma[None, :] + beta[None, :]
    w_t = jnp.transpose(w_cls)
    logits_f32 = f @ w_t
    # bf16-aware reference mirroring the kernel's MXU input dtype (f32 accumulation).
    logits_bf16 = jnp.dot(f.astype(jnp.bfloat16), w_t.astype(jnp.bfloat16),
                          preferred_element_type=jnp.float32)
    return logits_f32, logits_bf16, f


if __name__ == "__main__":
    key = jax.random.PRNGKey(0)
    # Small shapes consistent with the module (post-GAP features):
    # batch=6 (exercises padded-row handling), input_dim=64, class_num=300.
    B, D, C = 6, 64, 300

    kx, kw = jax.random.split(key)
    x = jax.random.normal(kx, (B, D, 1, 1), dtype=jnp.float32)

    # Parameters matching the module init schemes:
    gamma = jnp.ones((D,), jnp.float32)                               # BN weight = 1.0
    beta = jnp.zeros((D,), jnp.float32)                               # BN bias = 0.0
    w_cls = 0.001 * jax.random.normal(kw, (C, D), dtype=jnp.float32)  # Linear(D,C), std=1e-3

    # One-time parameter preparation (padding + bf16 cast of W happens only here).
    params = prepare_classification_params(gamma, beta, w_cls, max_batch=B)

    logits, feats = classification_block(x, params)
    jax.block_until_ready((logits, feats))

    ref_logits_f32, ref_logits_bf16, ref_feats = _reference(x, gamma, beta, w_cls)
    assert logits.shape == (B, C) and feats.shape == (B, D)
    # Features are computed fully in f32 -> tight match.
    assert jnp.allclose(feats, ref_feats, atol=1e-5, rtol=1e-5)
    # Logits match a bf16-input / f32-accumulate reference tightly ...
    assert jnp.allclose(logits, ref_logits_bf16, atol=2e-5, rtol=1e-2)
    # ... and the pure-f32 reference within bf16 rounding of ~1e-3-scale weights.
    assert jnp.allclose(logits, ref_logits_f32, atol=2e-4, rtol=2e-2)

    print("KERNEL_OK")
</pallas_src>

<mosaic_0001>
module attributes {stable_mosaic.version = 11 : i64} {
  func.func @_bn_kernel(%arg0: i32, %arg1: memref<8x128xf32, #tpu.memory_space<vmem>>, %arg2: memref<1x128xf32, #tpu.memory_space<vmem>>, %arg3: memref<1x128xf32, #tpu.memory_space<vmem>>, %arg4: memref<8x128xf32, #tpu.memory_space<vmem>>, %arg5: memref<8x128xbf16, #tpu.memory_space<vmem>>) attributes {dimension_semantics = [#tpu.dimension_semantics<arbitrary>], iteration_bounds = array<i64: 1>, scalar_prefetch = 0 : i64, scratch_operands = 0 : i64, tpu.core_type = #tpu.core_type<tc>, window_params = [{pipeline_mode = #tpu.pipeline_mode<synchronous>, transform_indices = @transform_0, window_bounds = array<i64: 8, 128>}, {pipeline_mode = #tpu.pipeline_mode<synchronous>, transform_indices = @transform_1, window_bounds = array<i64: 1, 128>}, {pipeline_mode = #tpu.pipeline_mode<synchronous>, transform_indices = @transform_2, window_bounds = array<i64: 1, 128>}, {pipeline_mode = #tpu.pipeline_mode<synchronous>, transform_indices = @transform_3, window_bounds = array<i64: 8, 128>}, {pipeline_mode = #tpu.pipeline_mode<synchronous>, transform_indices = @transform_4, window_bounds = array<i64: 8, 128>}]} {
    %c0 = arith.constant 0 : index
    %c0_0 = arith.constant 0 : index
    %0 = vector.load %arg1[%c0, %c0_0] : memref<8x128xf32, #tpu.memory_space<vmem>>, vector<8x128xf32>
    %cst = arith.constant dense<0.000000e+00> : vector<128xf32>
    %1 = vector.multi_reduction <add>, %0, %cst [0] : vector<8x128xf32> to vector<128xf32>
    %2 = vector.shape_cast %1 : vector<128xf32> to vector<1x128xf32>
    %cst_1 = arith.constant 0.166666672 : f32
    %3 = vector.broadcast %cst_1 : f32 to vector<1x128xf32>
    %4 = arith.mulf %2, %3 : vector<1x128xf32>
    %5 = arith.mulf %0, %0 : vector<8x128xf32>
    %cst_2 = arith.constant dense<0.000000e+00> : vector<128xf32>
    %6 = vector.multi_reduction <add>, %5, %cst_2 [0] : vector<8x128xf32> to vector<128xf32>
    %7 = vector.shape_cast %6 : vector<128xf32> to vector<1x128xf32>
    %cst_3 = arith.constant 0.166666672 : f32
    %8 = vector.broadcast %cst_3 : f32 to vector<1x128xf32>
    %9 = arith.mulf %7, %8 : vector<1x128xf32>
    %10 = arith.mulf %4, %4 : vector<1x128xf32>
    %11 = arith.subf %9, %10 : vector<1x128xf32>
    %cst_4 = arith.constant 0.000000e+00 : f32
    %12 = vector.broadcast %cst_4 : f32 to vector<1x128xf32>
    %13 = arith.maximumf %11, %12 : vector<1x128xf32>
    %cst_5 = arith.constant 9.99999974E-6 : f32
    %14 = vector.broadcast %cst_5 : f32 to vector<1x128xf32>
    %15 = arith.addf %13, %14 : vector<1x128xf32>
    %16 = math.rsqrt %15 : vector<1x128xf32>
    %c0_6 = arith.constant 0 : index
    %c0_7 = arith.constant 0 : index
    %17 = vector.load %arg2[%c0_6, %c0_7] : memref<1x128xf32, #tpu.memory_space<vmem>>, vector<1x128xf32>
    %18 = arith.mulf %16, %17 : vector<1x128xf32>
    %19 = vector.broadcast %4 : vector<1x128xf32> to vector<8x128xf32>
    %20 = arith.subf %0, %19 : vector<8x128xf32>
    %21 = vector.broadcast %18 : vector<1x128xf32> to vector<8x128xf32>
    %22 = arith.mulf %20, %21 : vector<8x128xf32>
    %c0_8 = arith.constant 0 : index
    %c0_9 = arith.constant 0 : index
    %23 = vector.load %arg3[%c0_8, %c0_9] : memref<1x128xf32, #tpu.memory_space<vmem>>, vector<1x128xf32>
    %24 = vector.broadcast %23 : vector<1x128xf32> to vector<8x128xf32>
    %25 = arith.addf %22, %24 : vector<8x128xf32>
    %c0_10 = arith.constant 0 : index
    %c0_11 = arith.constant 0 : index
    %26 = vector.load %arg4[%c0_10, %c0_11] : memref<8x128xf32, #tpu.memory_space<vmem>>, vector<8x128xf32>
    tpu.vector_store %arg4[%c0_10, %c0_11], %25 {strides = array<i32>} : memref<8x128xf32, #tpu.memory_space<vmem>>, vector<8x128xf32>,
    %27 = arith.truncf %25 : vector<8x128xf32> to vector<8x128xbf16>
    %c0_12 = arith.constant 0 : index
    %c0_13 = arith.constant 0 : index
    %28 = vector.load %arg5[%c0_12, %c0_13] : memref<8x128xbf16, #tpu.memory_space<vmem>>, vector<8x128xbf16>
    tpu.vector_store %arg5[%c0_12, %c0_13], %27 {strides = array<i32>} : memref<8x128xbf16, #tpu.memory_space<vmem>>, vector<8x128xbf16>,
    return
  }
  func.func @transform_0(%arg0: i32) -> (i32, i32) {
    %c0_i32 = arith.constant 0 : i32
    %c0_i32_0 = arith.constant 0 : i32
    %c0_i32_1 = arith.constant 0 : i32
    return %c0_i32, %c0_i32_0 : i32, i32
  }
  func.func @transform_1(%arg0: i32) -> (i32, i32) {
    %c0_i32 = arith.constant 0 : i32
    %c0_i32_0 = arith.constant 0 : i32
    %c0_i32_1 = arith.constant 0 : i32
    return %c0_i32, %c0_i32_0 : i32, i32
  }
  func.func @transform_2(%arg0: i32) -> (i32, i32) {
    %c0_i32 = arith.constant 0 : i32
    %c0_i32_0 = arith.constant 0 : i32
    %c0_i32_1 = arith.constant 0 : i32
    return %c0_i32, %c0_i32_0 : i32, i32
  }
  func.func @transform_3(%arg0: i32) -> (i32, i32) {
    %c0_i32 = arith.constant 0 : i32
    %c0_i32_0 = arith.constant 0 : i32
    %c0_i32_1 = arith.constant 0 : i32
    return %c0_i32, %c0_i32_0 : i32, i32
  }
  func.func @transform_4(%arg0: i32) -> (i32, i32) {
    %c0_i32 = arith.constant 0 : i32
    %c0_i32_0 = arith.constant 0 : i32
    %c0_i32_1 = arith.constant 0 : i32
    return %c0_i32, %c0_i32_0 : i32, i32
  }
}

</mosaic_0001>

<bundles_post_ra>
// kernel: tpu_custom_call.1
= control target key start
LH: loop header
LB: loop body
LE: loop exit
PB: predicated region body
PF: predicated region fallthrough
CT: control target
= control target key end

     0   :  { %10 = vsyncpa [#allocation3], 0  ;;  %s278_s0 = inlined_call_operand.hbm [shape: f32[8,128], index: 0, kind: input, shape index: {}]   ;;  %s279_s1 = inlined_call_operand.hbm [shape: f32[1,128], index: 1, kind: input, shape index: {}]   ;;  %s280_s2 = inlined_call_operand.vmem [shape: f32[1,128], index: 2, kind: input, shape index: {}]   ;;  %s281_s3 = inlined_call_operand.hbm [shape: f32[8,128], index: 3, kind: output, shape index: {0}]   ;;  %s282_s4 = inlined_call_operand.hbm [shape: bf16[8,128], index: 4, kind: output, shape index: {1}]  }
   0x1   :  { %11 = vsyncpa [#allocation6], 0 }
   0x2   :  { %12 = vsyncpa [#allocation4], 0 }
   0x3   :  { %13 = vsyncpa [#allocation9], 0  ;;  %s19_s17 = sshll.u32 %s278_s0, 4  ;;  %s234_s18 = smov [#allocation2]   ;;  %s20_s17 = int_to_ptr.hbm [resolvable:$true] %s19_s17 }
   0x4   :  { %s21_s19 = sshll.u32 %s234_s18, 4  ;;  %s30_s22 = sshll.u32 %s279_s1, 4  ;;  %s22_s19 = int_to_ptr.vmem [resolvable:$true] %s21_s19  ;;  %s31_s22 = int_to_ptr.hbm [resolvable:$true] %s30_s22 }
   0x5   :  { %24 = dma.hbm_to_vmem [thread:$0]  %s20_s17, 128, %s22_s19, [#allocation3]  }
   0x6   :  { %s235_s23 = smov [#allocation5]  }
   0x7   :  { %s32_s24 = sshll.u32 %s235_s23, 4  ;;  %s33_s24 = int_to_ptr.vmem [resolvable:$true] %s32_s24 }
   0x8   :  { %35 = dma.hbm_to_vmem [thread:$0]  %s31_s22, 16, %s33_s24, [#allocation6]  }
   0x9   :  { %226 = dma.done.wait [#allocation3], 128  }
   0xa   :  { %227 = vsyncadd [#allocation3], 4294967168 }
   0xb   :  { %228 = dma.done.wait [#allocation6], 16  }
   0xc   :  { %229 = vsyncadd [#allocation6], 4294967280  ;;  %v46_v0 = vld [vmem:[#allocation2] sm:$0xff]  ;;  %v76_v26 = vld [vmem:[#allocation5] sm:$0x1]  ;;  %s236_s25 = smov [#allocation7]  }
   0xd   :  { %v47_v1 = vrot.slane %v46_v0, 4  ;;  %v54_v2 = vmul.f32 %v46_v0, %v46_v0  ;;  %v127_v31 = vld [vmem:[%s280_s2] ss:$0 sm:$0xff]  ;;  %s94_s26 = sshll.u32 %s236_s25, 4  ;;  %s96_s29 = sshll.u32 %s281_s3, 4  ;;  %s95_s26 = int_to_ptr.vmem [resolvable:$true] %s94_s26  ;;  %s97_s29 = int_to_ptr.hbm [resolvable:$true] %s96_s29 }
   0xe   :  { %s237_s30 = smov [#allocation8]   ;;  %s107_s8 = sshll.u32 %s282_s4, 4  ;;  %s108_s8 = int_to_ptr.hbm [resolvable:$true] %s107_s8 }
   0xf   :  { %v48_v3 = vadd.f32 %v47_v1, %v46_v0  ;;  %v55_v4 = vrot.slane %v54_v2, 4  ;;  %s105_s5 = sshll.u32 %s237_s30, 4  ;;  %s106_s5 = int_to_ptr.vmem [resolvable:$true] %s105_s5 }
  0x11   :  { %v49_v5 = vrot.slane %v48_v3, 2  ;;  %v56_v6 = vadd.f32 %v55_v4, %v54_v2 }
  0x13   :  { %v50_v7 = vadd.f32 %v49_v5, %v48_v3  ;;  %v57_v8 = vrot.slane %v56_v6, 2 }
  0x15   :  { %v51_v9 = vrot.slane %v50_v7, 1  ;;  %v58_v10 = vadd.f32 %v57_v8, %v56_v6 }
  0x17   :  { %v52_v11 = vadd.f32 %v51_v9, %v50_v7  ;;  %v59_v12 = vrot.slane %v58_v10, 1 }
  0x19   :  { %v53_v13 = vmul.f32 0.16666667, %v52_v11  ;;  %v60_v14 = vadd.f32 %v59_v12, %v58_v10 }
  0x1b   :  { %v61_v15 = vmul.f32 0.16666667, %v60_v14  ;;  %v62_v16 = vmul.f32 %v53_v13, %v53_v13  ;;  %v78_v29 = vsub.f32 %v46_v0, %v53_v13 }
  0x1d   :  { %v63_v17 = vsub.f32 %v61_v15, %v62_v16 }
  0x1f   :  { %v64_v18 = vmax.f32 %v63_v17, 0.0 }
  0x21   :  { %v65_v19 = vadd.f32 1e-05, %v64_v18 }
  0x23   :  { %128 = vrsqrt.f32 %v65_v19  ;;  %vm72_vm0 = vweird.f32 %v65_v19 }
  0x29   :  { %v129_v20 = vpop.eup %128 }
  0x2a   :  { %v67_v21 = vmul.f32 %v129_v20, %v65_v19  ;;  %vm73_vm1 = vweird.f32 %v129_v20 }
  0x2b   :  { %vm74_vm2 = vmor %vm72_vm0, %vm73_vm1 }
  0x2c   :  { %v68_v22 = vmul.f32 %v129_v20, %v67_v21 }
  0x2e   :  { %v69_v23 = vmul.f32 0.5, %v68_v22 }
  0x30   :  { %v70_v24 = vsub.f32 1.5, %v69_v23 }
  0x32   :  { %v71_v25 = vmul.f32 %v129_v20, %v70_v24 }
  0x34   :  { %v75_v27 = vsel %vm74_vm2, %v129_v20, %v71_v25 }
  0x35   :  { %v77_v28 = vmul.f32 %v76_v26, %v75_v27 }
  0x37   :  { %v79_v30 = vperm.slane %v77_v28, 0 }
  0x39   :  { %v80_v32 = vmul.f32 %v79_v30, %v78_v29 }
  0x3b   :  { %v85_v33 = vadd.f32 %v127_v31, %v80_v32 }
  0x3d   :  { %86 = vst [vmem:[#allocation7] sm:$0xff] %v85_v33  ;;  %v87_v34 = vpack.c.bf16 %v85_v33, %v85_v33 }
  0x3e   :  { %99 = dma.vmem_to_hbm [thread:$0]  %s95_s26, 128, %s97_s29, [#allocation4]  }
  0x3f   :  { %88 = vst [vmem:[#allocation8] sm:$0xf] %v87_v34 }
  0x40   :  { %110 = dma.vmem_to_hbm [thread:$0]  %s106_s5, 64, %s108_s8, [#allocation9]  }
  0x41   :  { %230 = dma.done.wait [#allocation4], 128  }
  0x42   :  { %231 = vsyncadd [#allocation4], 4294967168 }
  0x43   :  { %232 = dma.done.wait [#allocation9], 64  }
  0x44   :  { %233 = vsyncadd [#allocation9], 4294967232 }
  0x45   :  { %119 = vsyncpa [#allocation3], 1 }
  0x46   :  { %120 = vsyncpa [#allocation6], 1 }
  0x47   :  { %121 = vsyncpa [#allocation4], 1 }
  0x48   :  { %122 = vsyncpa [#allocation9], 1 }

</bundles_post_ra>
